<compile_context>
chip_gen: v6e
topology: v6e:2x2x1
jax: 0.10.0
libtpu: 0.0.40
codegen_flags: <defaults>
</compile_context>

<pallas_src>
import functools

import jax
import jax.numpy as jnp
from jax.experimental import pallas as pl
from jax.experimental.pallas import tpu as pltpu

_HIDDEN = 256
_LANE = 128
_SINGLE_BLOCK_MAX = 256          # below this, a single block (overhead paid once)
_DEFAULT_BLOCK_B = 2048          # amortizes the ~0.35us per-grid-step overhead
_VMEM_LIMIT_BYTES = 32 * 1024 * 1024  # raise v5e's 16MiB default; safe on v6e/v7x


def _round_up(x, m):
    return ((x + m - 1) // m) * m


def _actor_kernel(x_ref, w1_ref, b1_ref, w2_ref, b2_ref, w3_ref, b3_ref,
                  o_ref, *, max_action):
    # Matmul inputs in bf16 (native MXU dtype), accumulate in f32.
    x = x_ref[...].astype(jnp.bfloat16)

    # l1 + relu   (bias / relu in f32)
    h1 = jnp.dot(x, w1_ref[...], preferred_element_type=jnp.float32)
    h1 = jnp.maximum(h1 + b1_ref[...], 0.0)

    # l2 + relu   (the only MXU-efficient matmul: 256x256 contraction)
    h2 = jnp.dot(h1.astype(jnp.bfloat16), w2_ref[...],
                 preferred_element_type=jnp.float32)
    h2 = jnp.maximum(h2 + b2_ref[...], 0.0)

    # l3 + tanh * max_action  (lane-dense padded output, stored bf16)
    a = jnp.dot(h2.astype(jnp.bfloat16), w3_ref[...],
                preferred_element_type=jnp.float32)
    a = max_action * jnp.tanh(a + b3_ref[...])

    o_ref[...] = a.astype(o_ref.dtype)


def prepare_actor_params(params):
    """One-time parameter prep (hoisted out of the forward path).

    Casts weights to bf16 and pads l3's output dim to a lane-dense multiple of
    128.  Returns (prepared_param_dict, action_dim).  Call once, reuse for
    every forward call.
    """
    H = params["W1"].shape[1]
    action_dim = params["W3"].shape[1]
    a_pad = _round_up(action_dim, _LANE)

    w3 = jnp.zeros((H, a_pad), jnp.bfloat16)
    w3 = w3.at[:, :action_dim].set(params["W3"].astype(jnp.bfloat16))
    b3 = jnp.zeros((1, a_pad), jnp.float32)
    b3 = b3.at[:, :action_dim].set(
        params["b3"].reshape(1, -1).astype(jnp.float32))

    prep = {
        "W1": params["W1"].astype(jnp.bfloat16),
        "b1": params["b1"].reshape(1, -1).astype(jnp.float32),
        "W2": params["W2"].astype(jnp.bfloat16),
        "b2": params["b2"].reshape(1, -1).astype(jnp.float32),
        "W3": w3,
        "b3": b3,
    }
    return prep, action_dim


def actor_forward(state, prep, max_action, action_dim, *,
                  block_b=_DEFAULT_BLOCK_B, out_dtype=jnp.float32):
    """state: [B, state_dim] f32.  prep: output of prepare_actor_params.
    Returns [B, action_dim] in out_dtype (default f32, matching the module)."""
    B, state_dim = state.shape
    H = prep["W1"].shape[1]
    a_pad = prep["W3"].shape[1]

    # Batch tiling: single block for tiny batches; otherwise >=2 grid steps
    # (so both v7x TensorCores get work on the "parallel" axis), capped at
    # block_b to amortize per-step pipeline overhead.  16-row alignment keeps
    # the bf16 output block sublane-friendly.
    if B <= _SINGLE_BLOCK_MAX:
        tb = B
    else:
        tb = min(block_b, _round_up(pl.cdiv(B, 2), 16))
    grid = (pl.cdiv(B, tb),)   # ragged last block; no padded copy of state

    kernel = functools.partial(_actor_kernel, max_action=float(max_action))

    # Weights & biases: constant index_map -> VMEM-resident across grid steps.
    def _const(shape):
        return pl.BlockSpec(shape, lambda i: (0, 0))

    in_specs = [
        pl.BlockSpec((tb, state_dim), lambda i: (i, 0)),   # state tile
        _const(prep["W1"].shape), _const(prep["b1"].shape),
        _const(prep["W2"].shape), _const(prep["b2"].shape),
        _const(prep["W3"].shape), _const(prep["b3"].shape),
    ]
    out_specs = pl.BlockSpec((tb, a_pad), lambda i: (i, 0))

    cost = pl.CostEstimate(
        flops=2 * B * (state_dim * H + H * H + H * a_pad),
        transcendentals=B * action_dim,
        bytes_accessed=(state.size * 4
                        + (prep["W1"].size + prep["W2"].size
                           + prep["W3"].size) * 2
                        + (prep["b1"].size + prep["b2"].size
                           + prep["b3"].size) * 4
                        + B * a_pad * 2),
    )

    out_padded = pl.pallas_call(
        kernel,
        out_shape=jax.ShapeDtypeStruct((B, a_pad), jnp.bfloat16),
        grid=grid,
        in_specs=in_specs,
        out_specs=out_specs,
        compiler_params=pltpu.CompilerParams(
            dimension_semantics=("parallel",),
            vmem_limit_bytes=_VMEM_LIMIT_BYTES),
        cost_estimate=cost,
    )(state, prep["W1"], prep["b1"], prep["W2"], prep["b2"],
      prep["W3"], prep["b3"])

    # Slice off padded action lanes; cast back to the requested output dtype.
    return out_padded[:, :action_dim].astype(out_dtype)


def init_actor_params(key, state_dim, action_dim, hidden=_HIDDEN):
    """Deterministic init matching PyTorch nn.Linear default:
    U(-1/sqrt(fan_in), 1/sqrt(fan_in)) for both weight and bias."""
    def linear(k, fan_in, fan_out):
        kw, kb = jax.random.split(k)
        bound = 1.0 / jnp.sqrt(float(fan_in))
        # stored as [in, out] so the kernel computes x @ W
        w = jax.random.uniform(kw, (fan_in, fan_out), jnp.float32, -bound, bound)
        b = jax.random.uniform(kb, (1, fan_out), jnp.float32, -bound, bound)
        return w, b

    k1, k2, k3 = jax.random.split(key, 3)
    W1, b1 = linear(k1, state_dim, hidden)
    W2, b2 = linear(k2, hidden, hidden)
    W3, b3 = linear(k3, hidden, action_dim)
    return {"W1": W1, "b1": b1, "W2": W2, "b2": b2, "W3": W3, "b3": b3}


def actor_reference(state, params, max_action):
    """Pure-JAX f32 reference for correctness checking."""
    h1 = jnp.maximum(state @ params["W1"] + params["b1"], 0.0)
    h2 = jnp.maximum(h1 @ params["W2"] + params["b2"], 0.0)
    return max_action * jnp.tanh(h2 @ params["W3"] + params["b3"])


if __name__ == "__main__":
    key = jax.random.PRNGKey(0)
    k_param, k_state1, k_state2 = jax.random.split(key, 3)

    state_dim = 16
    action_dim = 8
    max_action = 2.0

    params = init_actor_params(k_param, state_dim, action_dim)
    prep, adim = prepare_actor_params(params)   # hoisted one-time prep

    # Tolerance loosened vs the f32 reference: bf16 MXU inputs (f32 accum)
    # plus bf16 output writeback; |out| <= max_action = 2.
    ATOL = 5e-2
    RTOL = 5e-2

    # Case 1: tiny batch (single-block path).
    state_small = jax.random.normal(k_state1, (2, state_dim), jnp.float32)
    out_small = jax.block_until_ready(
        actor_forward(state_small, prep, max_action, adim, block_b=2048))
    ref_small = actor_reference(state_small, params, max_action)
    assert out_small.shape == (2, action_dim), out_small.shape
    assert jnp.allclose(out_small, ref_small, atol=ATOL, rtol=RTOL), (
        f"small-batch max abs err = {jnp.max(jnp.abs(out_small - ref_small))}")

    # Case 2: batch > single-block threshold (exercises >=2 grid steps and the
    # ragged last block, with no padded copy of the state tensor).
    state_big = jax.random.normal(k_state2, (300, state_dim), jnp.float32)
    out_big = jax.block_until_ready(
        actor_forward(state_big, prep, max_action, adim, block_b=2048))
    ref_big = actor_reference(state_big, params, max_action)
    assert out_big.shape == (300, action_dim), out_big.shape
    assert jnp.allclose(out_big, ref_big, atol=ATOL, rtol=RTOL), (
        f"big-batch max abs err = {jnp.max(jnp.abs(out_big - ref_big))}")

    print("KERNEL_OK")
</pallas_src>

<mosaic_0001>
module attributes {stable_mosaic.version = 11 : i64} {
  func.func @_actor_kernel(%arg0: i32, %arg1: memref<2x16xf32, #tpu.memory_space<vmem>>, %arg2: memref<16x256xbf16, #tpu.memory_space<vmem>>, %arg3: memref<1x256xf32, #tpu.memory_space<vmem>>, %arg4: memref<256x256xbf16, #tpu.memory_space<vmem>>, %arg5: memref<1x256xf32, #tpu.memory_space<vmem>>, %arg6: memref<256x128xbf16, #tpu.memory_space<vmem>>, %arg7: memref<1x128xf32, #tpu.memory_space<vmem>>, %arg8: memref<2x128xbf16, #tpu.memory_space<vmem>>) attributes {dimension_semantics = [#tpu.dimension_semantics<parallel>], iteration_bounds = array<i64: 1>, scalar_prefetch = 0 : i64, scratch_operands = 0 : i64, tpu.core_type = #tpu.core_type<tc>, window_params = [{transform_indices = @transform_0, window_bounds = array<i64: 2, 16>}, {pipeline_mode = #tpu.pipeline_mode<synchronous>, transform_indices = @transform_1, window_bounds = array<i64: 16, 256>}, {pipeline_mode = #tpu.pipeline_mode<synchronous>, transform_indices = @transform_2, window_bounds = array<i64: 1, 256>}, {pipeline_mode = #tpu.pipeline_mode<synchronous>, transform_indices = @transform_3, window_bounds = array<i64: 256, 256>}, {pipeline_mode = #tpu.pipeline_mode<synchronous>, transform_indices = @transform_4, window_bounds = array<i64: 1, 256>}, {pipeline_mode = #tpu.pipeline_mode<synchronous>, transform_indices = @transform_5, window_bounds = array<i64: 256, 128>}, {pipeline_mode = #tpu.pipeline_mode<synchronous>, transform_indices = @transform_6, window_bounds = array<i64: 1, 128>}, {transform_indices = @transform_7, window_bounds = array<i64: 2, 128>}]} {
    %c0 = arith.constant 0 : index
    %c0_0 = arith.constant 0 : index
    %0 = vector.load %arg1[%c0, %c0_0] : memref<2x16xf32, #tpu.memory_space<vmem>>, vector<2x16xf32>
    %1 = arith.truncf %0 : vector<2x16xf32> to vector<2x16xbf16>
    %c0_1 = arith.constant 0 : index
    %c0_2 = arith.constant 0 : index
    %2 = vector.load %arg2[%c0_1, %c0_2] : memref<16x256xbf16, #tpu.memory_space<vmem>>, vector<16x256xbf16>
    %cst = arith.constant dense<0.000000e+00> : vector<2x256xf32>
    %3 = tpu.matmul %1, %2, %cst {dimension_numbers = #tpu.dot_dimension_numbers<[1], [0], [0], [1], [0, 0, 1, 1], [], []>} : vector<2x16xbf16>, vector<16x256xbf16>, vector<2x256xf32> -> vector<2x256xf32>
    %c0_3 = arith.constant 0 : index
    %c0_4 = arith.constant 0 : index
    %4 = vector.load %arg3[%c0_3, %c0_4] : memref<1x256xf32, #tpu.memory_space<vmem>>, vector<1x256xf32>
    %5 = vector.broadcast %4 : vector<1x256xf32> to vector<2x256xf32>
    %6 = arith.addf %3, %5 : vector<2x256xf32>
    %cst_5 = arith.constant 0.000000e+00 : f32
    %7 = vector.broadcast %cst_5 : f32 to vector<2x256xf32>
    %8 = arith.maximumf %6, %7 : vector<2x256xf32>
    %9 = arith.truncf %8 : vector<2x256xf32> to vector<2x256xbf16>
    %c0_6 = arith.constant 0 : index
    %c0_7 = arith.constant 0 : index
    %10 = vector.load %arg4[%c0_6, %c0_7] : memref<256x256xbf16, #tpu.memory_space<vmem>>, vector<256x256xbf16>
    %cst_8 = arith.constant dense<0.000000e+00> : vector<2x256xf32>
    %11 = tpu.matmul %9, %10, %cst_8 {dimension_numbers = #tpu.dot_dimension_numbers<[1], [0], [0], [1], [0, 0, 1, 1], [], []>} : vector<2x256xbf16>, vector<256x256xbf16>, vector<2x256xf32> -> vector<2x256xf32>
    %c0_9 = arith.constant 0 : index
    %c0_10 = arith.constant 0 : index
    %12 = vector.load %arg5[%c0_9, %c0_10] : memref<1x256xf32, #tpu.memory_space<vmem>>, vector<1x256xf32>
    %13 = vector.broadcast %12 : vector<1x256xf32> to vector<2x256xf32>
    %14 = arith.addf %11, %13 : vector<2x256xf32>
    %cst_11 = arith.constant 0.000000e+00 : f32
    %15 = vector.broadcast %cst_11 : f32 to vector<2x256xf32>
    %16 = arith.maximumf %14, %15 : vector<2x256xf32>
    %17 = arith.truncf %16 : vector<2x256xf32> to vector<2x256xbf16>
    %c0_12 = arith.constant 0 : index
    %c0_13 = arith.constant 0 : index
    %18 = vector.load %arg6[%c0_12, %c0_13] : memref<256x128xbf16, #tpu.memory_space<vmem>>, vector<256x128xbf16>
    %cst_14 = arith.constant dense<0.000000e+00> : vector<2x128xf32>
    %19 = tpu.matmul %17, %18, %cst_14 {dimension_numbers = #tpu.dot_dimension_numbers<[1], [0], [0], [1], [0, 0, 1, 1], [], []>} : vector<2x256xbf16>, vector<256x128xbf16>, vector<2x128xf32> -> vector<2x128xf32>
    %c0_15 = arith.constant 0 : index
    %c0_16 = arith.constant 0 : index
    %20 = vector.load %arg7[%c0_15, %c0_16] : memref<1x128xf32, #tpu.memory_space<vmem>>, vector<1x128xf32>
    %21 = vector.broadcast %20 : vector<1x128xf32> to vector<2x128xf32>
    %22 = arith.addf %19, %21 : vector<2x128xf32>
    %23 = math.tanh %22 : vector<2x128xf32>
    %cst_17 = arith.constant 2.000000e+00 : f32
    %24 = vector.broadcast %cst_17 : f32 to vector<2x128xf32>
    %25 = arith.mulf %24, %23 : vector<2x128xf32>
    %26 = arith.truncf %25 : vector<2x128xf32> to vector<2x128xbf16>
    %c0_18 = arith.constant 0 : index
    %c0_19 = arith.constant 0 : index
    %27 = vector.load %arg8[%c0_18, %c0_19] : memref<2x128xbf16, #tpu.memory_space<vmem>>, vector<2x128xbf16>
    tpu.vector_store %arg8[%c0_18, %c0_19], %26 {strides = array<i32>} : memref<2x128xbf16, #tpu.memory_space<vmem>>, vector<2x128xbf16>,
    return
  }
  func.func @transform_0(%arg0: i32) -> (i32, i32) {
    %c0_i32 = arith.constant 0 : i32
    %c0_i32_0 = arith.constant 0 : i32
    return %arg0, %c0_i32 : i32, i32
  }
  func.func @transform_1(%arg0: i32) -> (i32, i32) {
    %c0_i32 = arith.constant 0 : i32
    %c0_i32_0 = arith.constant 0 : i32
    %c0_i32_1 = arith.constant 0 : i32
    return %c0_i32, %c0_i32_0 : i32, i32
  }
  func.func @transform_2(%arg0: i32) -> (i32, i32) {
    %c0_i32 = arith.constant 0 : i32
    %c0_i32_0 = arith.constant 0 : i32
    %c0_i32_1 = arith.constant 0 : i32
    return %c0_i32, %c0_i32_0 : i32, i32
  }
  func.func @transform_3(%arg0: i32) -> (i32, i32) {
    %c0_i32 = arith.constant 0 : i32
    %c0_i32_0 = arith.constant 0 : i32
    %c0_i32_1 = arith.constant 0 : i32
    return %c0_i32, %c0_i32_0 : i32, i32
  }
  func.func @transform_4(%arg0: i32) -> (i32, i32) {
    %c0_i32 = arith.constant 0 : i32
    %c0_i32_0 = arith.constant 0 : i32
    %c0_i32_1 = arith.constant 0 : i32
    return %c0_i32, %c0_i32_0 : i32, i32
  }
  func.func @transform_5(%arg0: i32) -> (i32, i32) {
    %c0_i32 = arith.constant 0 : i32
    %c0_i32_0 = arith.constant 0 : i32
    %c0_i32_1 = arith.constant 0 : i32
    return %c0_i32, %c0_i32_0 : i32, i32
  }
  func.func @transform_6(%arg0: i32) -> (i32, i32) {
    %c0_i32 = arith.constant 0 : i32
    %c0_i32_0 = arith.constant 0 : i32
    %c0_i32_1 = arith.constant 0 : i32
    return %c0_i32, %c0_i32_0 : i32, i32
  }
  func.func @transform_7(%arg0: i32) -> (i32, i32) {
    %c0_i32 = arith.constant 0 : i32
    %c0_i32_0 = arith.constant 0 : i32
    return %arg0, %c0_i32 : i32, i32
  }
}

</mosaic_0001>

<bundles_post_ra>
// kernel: tpu_custom_call.1
= control target key start
LH: loop header
LB: loop body
LE: loop exit
PB: predicated region body
PF: predicated region fallthrough
CT: control target
= control target key end

     0   :  { %12 = vsyncpa [#allocation3], 0  ;;  %s936_s0 = inlined_call_operand.hbm [shape: f32[2,16], index: 0, kind: input, shape index: {}]   ;;  %s937_s1 = inlined_call_operand.hbm [shape: bf16[16,256], index: 1, kind: input, shape index: {}]   ;;  %s938_s2 = inlined_call_operand.vmem [shape: f32[1,256], index: 2, kind: input, shape index: {}]   ;;  %s939_s3 = inlined_call_operand.hbm [shape: bf16[256,256], index: 3, kind: input, shape index: {}]   ;;  %s940_s4 = inlined_call_operand.vmem [shape: f32[1,256], index: 4, kind: input, shape index: {}]   ;;  %s941_s5 = inlined_call_operand.hbm [shape: bf16[256,128], index: 5, kind: input, shape index: {}]   ;;  %s942_s6 = inlined_call_operand.vmem [shape: f32[1,128], index: 6, kind: input, shape index: {}]   ;;  %s943_s7 = inlined_call_operand.hbm [shape: bf16[2,128], index: 7, kind: output, shape index: {}]  }
   0x1   :  { %13 = vsyncpa [#allocation6], 0 }
   0x2   :  { %14 = vsyncpa [#allocation9], 0 }
   0x3   :  { %15 = vsyncpa [#allocation4], 0  ;;  %s862_s24 = smov [#allocation5]  }
   0x4   :  { %s31_s25 = sshll.u32 %s862_s24, 4  ;;  %s32_s25 = int_to_ptr.vmem [resolvable:$true] %s31_s25 }
   0x5   :  { %s762_s26 = scalar_lea.vmem %s32_s25, 256  ;;  %p767_p1 = scmp.lt.s32.totalorder %s32_s25, %s32_s25 }
   0x6   :  { %p763_p0 = scmp.ne.s32.totalorder %s32_s25, %s762_s26  ;;  %p768_p2 = scmp.lt.s32.totalorder %s762_s26, %s762_s26 }
   0x8   :  { %p769_p3 = por %p768_p2, %p767_p1 }
   0xa   :  { %p770_p4 = pnand %p769_p3, %p763_p0 }
   0xc   :  { %773 = shalt.err (!%p770_p4)
}
   0xd   :  { %s863_s27 = smov 128   ;;  %s864_s28 = smov 8  }
   0xe   :  { %37 = dma.hbm_to_vmem [thread:$0]  %s937_s1, 256, %s32_s25, [#allocation6], %s863_s27, %s863_s27, %s864_s28  }
   0xf   :  { %s865_s8 = smov [#allocation2]   ;;  %s866_s10 = smov [#allocation7]  }
  0x10   :  { %s22_s9 = sshll.u32 %s865_s8, 4  ;;  %s45_s11 = sshll.u32 %s866_s10, 4  ;;  %s23_s9 = int_to_ptr.vmem [resolvable:$true] %s22_s9  ;;  %s46_s11 = int_to_ptr.vmem [resolvable:$true] %s45_s11 }
  0x11   :  { %s782_s12 = scalar_lea.vmem %s23_s9, 32  ;;  %p787_p6 = scmp.lt.s32.totalorder %s23_s9, %s23_s9 }
  0x12   :  { %p783_p5 = scmp.ne.s32.totalorder %s23_s9, %s782_s12  ;;  %p788_p7 = scmp.lt.s32.totalorder %s782_s12, %s782_s12 }
  0x14   :  { %p789_p8 = por %p788_p7, %p787_p6 }
  0x16   :  { %p790_p9 = pnand %p789_p8, %p783_p5 }
  0x18   :  { %793 = shalt.err (!%p790_p9)
}
  0x19   :  { %25 = dma.hbm_to_vmem [thread:$0]  %s936_s0, 32, %s23_s9, [#allocation3]  }
  0x1a   :  { %s802_s15 = scalar_lea.vmem %s46_s11, 4096  ;;  %p807_p11 = scmp.lt.s32.totalorder %s46_s11, %s46_s11 }
  0x1b   :  { %p803_p10 = scmp.ne.s32.totalorder %s46_s11, %s802_s15  ;;  %p808_p12 = scmp.lt.s32.totalorder %s802_s15, %s802_s15 }
  0x1d   :  { %p809_p13 = por %p808_p12, %p807_p11 }
  0x1f   :  { %p810_p0 = pnand %p809_p13, %p803_p10 }
  0x21   :  { %813 = shalt.err (!%p810_p0)
}
  0x22   :  { %51 = dma.hbm_to_vmem [thread:$0]  %s939_s3, 4096, %s46_s11, [#allocation6], %s863_s27, %s863_s27, %s864_s28  }
  0x23   :  { %s867_s17 = smov [#allocation8]  }
  0x24   :  { %s59_s18 = sshll.u32 %s867_s17, 4  ;;  %s60_s18 = int_to_ptr.vmem [resolvable:$true] %s59_s18 }
  0x25   :  { %s822_s19 = scalar_lea.vmem %s60_s18, 2048  ;;  %p827_p2 = scmp.lt.s32.totalorder %s60_s18, %s60_s18 }
  0x26   :  { %p823_p1 = scmp.ne.s32.totalorder %s60_s18, %s822_s19  ;;  %p828_p3 = scmp.lt.s32.totalorder %s822_s19, %s822_s19 }
  0x28   :  { %p829_p4 = por %p828_p3, %p827_p2 }
  0x2a   :  { %p830_p5 = pnand %p829_p4, %p823_p1 }
  0x2c   :  { %833 = shalt.err (!%p830_p5)
}
  0x2d   :  { %s868_s0 = smov 64   ;;  %s869_s20 = smov 4  }
  0x2e   :  { %65 = dma.hbm_to_vmem [thread:$0]  %s941_s5, 2048, %s60_s18, [#allocation9], %s868_s0, %s868_s0, %s869_s20  }
  0x2f   :  { %854 = dma.done.wait [#allocation3], 32  }
  0x30   :  { %855 = vsyncadd [#allocation3], 4294967264 }
  0x31   :  { %856 = dma.done.wait [#allocation6], 4352  }
  0x32   :  { %857 = vsyncadd [#allocation6], 4294962944 }
  0x33   :  { %858 = dma.done.wait [#allocation9], 2048  }
  0x34   :  { %859 = vsyncadd [#allocation9], 4294965248  ;;  %v870_v0 = vmov 0   ;;  %v685_v1 = vld [vmem:[#allocation5 + $0x4] ss:$8 sps:$4 sm:$0xff]   ;;  %vm107_vm0 = vcmask 130048   ;;  %v87_v49 = vlaneseq }
  0x35   :  { %143 = vmatprep.mubr.bf16.mxu0 %v870_v0  ;;  %v687_v2 = vld [vmem:[#allocation5] ss:$8 sps:$4 sm:$0xff]   ;;  %v81_v3 = vld [vmem:[#allocation2] sm:$0x3]  ;;  %125 = vmatprep.subr.bf16.mxu0 %v685_v1  ;;  %v688_v5 = vld [vmem:[#allocation7 + $0x74] ss:$8 sps:$4 sm:$0xff]  }
  0x36   :  { %v82_v4 = vpack.c.bf16 %v81_v3, %v81_v3  ;;  %v690_v6 = vld [vmem:[#allocation7 + $0x70] ss:$8 sps:$4 sm:$0xff]   ;;  %126 = vmatpush1.bf16.msra.mxu0 %v687_v2  ;;  %v691_v7 = vld [vmem:[#allocation7 + $0x64] ss:$8 sps:$4 sm:$0xff]   ;;  %360 = vmatprep.subr.bf16.mxu1 %v688_v5  ;;  %v693_v8 = vld [vmem:[#allocation7 + $0x60] ss:$8 sps:$4 sm:$0xff]  }
  0x37   :  { %361 = vmatpush1.bf16.msra.mxu1 %v690_v6  ;;  %v694_v9 = vld [vmem:[#allocation7 + $0x54] ss:$8 sps:$4 sm:$0xff]   ;;  %v696_v10 = vld [vmem:[#allocation7 + $0x50] ss:$8 sps:$4 sm:$0xff]   ;;  %v697_v11 = vld [vmem:[#allocation7 + $0x44] ss:$8 sps:$4 sm:$0xff]  }
  0x38   :  { %362 = vmatprep.subr.bf16.mxu1 %v691_v7  ;;  %v699_v12 = vld [vmem:[#allocation7 + $0x40] ss:$8 sps:$4 sm:$0xff]   ;;  %v700_v13 = vld [vmem:[#allocation7 + $0x34] ss:$8 sps:$4 sm:$0xff]   ;;  %v702_v14 = vld [vmem:[#allocation7 + $0x30] ss:$8 sps:$4 sm:$0xff]  }
  0x39   :  { %603 = vmatmul.mubr.msk.bf16.vlgmr.msra.gmra.mxu0 %vm107_vm0, %v82_v4  ;;  %v703_v15 = vld [vmem:[#allocation7 + $0x24] ss:$8 sps:$4 sm:$0xff]   ;;  %v705_v16 = vld [vmem:[#allocation7 + $0x20] ss:$8 sps:$4 sm:$0xff]   ;;  %v706_v17 = vld [vmem:[#allocation7 + $0x14] ss:$8 sps:$4 sm:$0xff]  }
  0x3a   :  { %v708_v18 = vld [vmem:[#allocation7 + $0x10] ss:$8 sps:$4 sm:$0xff]   ;;  %v709_v19 = vld [vmem:[#allocation7 + $0x4] ss:$8 sps:$4 sm:$0xff]   ;;  %v711_v20 = vld [vmem:[#allocation7] ss:$8 sps:$4 sm:$0xff]  }
  0x3b   :  { %363 = vmatpush1.bf16.msra.mxu1 %v693_v8  ;;  %v712_v21 = vld [vmem:[#allocation7 + $0xf4] ss:$8 sps:$4 sm:$0xff]   ;;  %v714_v22 = vld [vmem:[#allocation7 + $0xf0] ss:$8 sps:$4 sm:$0xff]   ;;  %v715_v23 = vld [vmem:[#allocation7 + $0xe4] ss:$8 sps:$4 sm:$0xff]  }
  0x3c   :  { %364 = vmatprep.subr.bf16.mxu1 %v694_v9  ;;  %v717_v24 = vld [vmem:[#allocation7 + $0xe0] ss:$8 sps:$4 sm:$0xff]   ;;  %v718_v25 = vld [vmem:[#allocation7 + $0xd4] ss:$8 sps:$4 sm:$0xff]   ;;  %v720_v26 = vld [vmem:[#allocation7 + $0xd0] ss:$8 sps:$4 sm:$0xff]  }
  0x3d   :  { %v721_v27 = vld [vmem:[#allocation7 + $0xc4] ss:$8 sps:$4 sm:$0xff]   ;;  %v723_v28 = vld [vmem:[#allocation7 + $0xc0] ss:$8 sps:$4 sm:$0xff]   ;;  %v724_v29 = vld [vmem:[#allocation7 + $0xb4] ss:$8 sps:$4 sm:$0xff]  }
  0x3e   :  { %v726_v30 = vld [vmem:[#allocation7 + $0xb0] ss:$8 sps:$4 sm:$0xff]   ;;  %v727_v31 = vld [vmem:[#allocation7 + $0xa4] ss:$8 sps:$4 sm:$0xff]   ;;  %v729_v32 = vld [vmem:[#allocation7 + $0xa0] ss:$8 sps:$4 sm:$0xff]  }
  0x3f   :  { %365 = vmatpush1.bf16.msra.mxu1 %v696_v10  ;;  %v730_v33 = vld [vmem:[#allocation7 + $0x94] ss:$8 sps:$4 sm:$0xff]   ;;  %v732_v34 = vld [vmem:[#allocation7 + $0x90] ss:$8 sps:$4 sm:$0xff]   ;;  %v733_v35 = vld [vmem:[#allocation7 + $0x84] ss:$8 sps:$4 sm:$0xff]  }
  0x40   :  { %366 = vmatprep.subr.bf16.mxu1 %v697_v11  ;;  %v735_v36 = vld [vmem:[#allocation7 + $0x80] ss:$8 sps:$4 sm:$0xff]   ;;  %v736_v37 = vld [vmem:[#allocation8 + $0x78] sm:$0xff]   ;;  %v738_v39 = vld [vmem:[#allocation8 + $0x70] sm:$0xff]   ;;  %v88_v50 = vshrl.u32 %v87_v49, 7 }
  0x41   :  { %v737_v38 = vld [vmem:[#allocation8 + $0x38] sm:$0xff]   ;;  %653 = vmatprep.subr.bf16.mxu0 %v736_v37  ;;  %v739_v40 = vld [vmem:[#allocation8 + $0x30] sm:$0xff]   ;;  %v740_v41 = vld [vmem:[#allocation8 + $0x68] sm:$0xff]  }
  0x42   :  { %654 = vmatpush3.bf16.msra.mxu0 %v737_v38  ;;  %v741_v42 = vld [vmem:[#allocation8 + $0x28] sm:$0xff]   ;;  %v742_v43 = vld [vmem:[#allocation8 + $0x60] sm:$0xff]   ;;  %v744_v45 = vld [vmem:[#allocation8 + $0x58] sm:$0xff]   ;;  %v89_v51 = vsub.s32 0, %v88_v50  ;;  %v93_v53 = vsub.s32 1, %v88_v50 }
  0x43   :  { %367 = vmatpush1.bf16.msra.mxu1 %v699_v12  ;;  %655 = vmatprep.subr.bf16.mxu0 %v738_v39  ;;  %v743_v44 = vld [vmem:[#allocation8 + $0x20] sm:$0xff]   ;;  %v745_v46 = vld [vmem:[#allocation8 + $0x18] sm:$0xff]   ;;  %v746_v47 = vld [vmem:[#allocation8 + $0x50] sm:$0xff]  }
  0x44   :  { %368 = vmatprep.subr.bf16.mxu1 %v700_v13  ;;  %v747_v48 = vld [vmem:[#allocation8 + $0x10] sm:$0xff]   ;;  %v85_v52 = vld [vmem:[%s938_s2] sm:$0x3]  ;;  %v750_v4 = vld [vmem:[#allocation8 + $0x40] sm:$0xff]  }
  0x45   :  { %v90_v54 = vrot.slane %v85_v52, %v89_v51  ;;  %v94_v55 = vrot.slane %v85_v52, %v93_v53  ;;  %v748_v2 = vld [vmem:[#allocation8 + $0x48] sm:$0xff]   ;;  %v751_v5 = vld [vmem:[#allocation8] sm:$0xff]  }
  0x46   :  { %656 = vmatpush3.bf16.msra.mxu0 %v739_v40  ;;  %v749_v3 = vld [vmem:[#allocation8 + $0x8] sm:$0xff]  }
  0x47   :  { %369 = vmatpush1.bf16.msra.mxu1 %v702_v14  ;;  %657 = vmatprep.subr.bf16.mxu0 %v740_v41  ;;  %v188_v6 = vld [vmem:[%s940_s4] sm:$0x3]  ;;  %s871_s4 = smov [#allocation10]  }
  0x48   :  { %370 = vmatprep.subr.bf16.mxu1 %v703_v15  ;;  %v193_v7 = vrot.slane %v188_v6, %v89_v51  ;;  %v197_v8 = vrot.slane %v188_v6, %v93_v53  ;;  %s590_s26 = sshll.u32 %s871_s4, 4  ;;  %s591_s26 = int_to_ptr.vmem [resolvable:$true] %s590_s26 }
  0x49   :  { %s834_s27 = scalar_lea.vmem %s591_s26, 16  ;;  %s838_s28 = scalar_lea.vmem %s591_s26, 32 }
  0x4a   :  { %658 = vmatpush3.bf16.msra.mxu0 %v741_v42  ;;  %p835_p6 = scmp.ne.s32.totalorder %s591_s26, %s834_s27  ;;  %p839_p7 = scmp.lt.s32.totalorder %s591_s26, %s591_s26 }
  0x4b   :  { %371 = vmatpush1.bf16.msra.mxu1 %v705_v16  ;;  %659 = vmatprep.subr.bf16.mxu0 %v742_v43  ;;  %p840_p8 = scmp.lt.s32.totalorder %s838_s28, %s834_s27 }
  0x4c   :  { %372 = vmatprep.subr.bf16.mxu1 %v706_v17 }
  0x4d   :  { %p841_p9 = por %p840_p8, %p839_p7 }
  0x4e   :  { %660 = vmatpush3.bf16.msra.mxu0 %v743_v44 }
  0x4f   :  { %373 = vmatpush1.bf16.msra.mxu1 %v708_v18  ;;  %661 = vmatprep.subr.bf16.mxu0 %v744_v45  ;;  %p842_p10 = pnand %p841_p9, %p835_p6 }
  0x50   :  { %374 = vmatprep.subr.bf16.mxu1 %v709_v19 }
  0x52   :  { %662 = vmatpush3.bf16.msra.mxu0 %v745_v46 }
  0x53   :  { %375 = vmatpush1.bf16.msra.mxu1 %v711_v20  ;;  %663 = vmatprep.subr.bf16.mxu0 %v746_v47  ;;  %v636_v20 = vld [vmem:[%s942_s6] ss:$0 sm:$0xff] }
  0x54   :  { %376 = vmatprep.subr.bf16.mxu1 %v712_v21 }
  0x56   :  { %664 = vmatpush3.bf16.msra.mxu0 %v747_v48 }
  0x57   :  { %377 = vmatpush2.bf16.msra.mxu1 %v714_v22  ;;  %665 = vmatprep.subr.bf16.mxu0 %v748_v2 }
  0x58   :  { %378 = vmatprep.subr.bf16.mxu1 %v715_v23 }
  0x5a   :  { %666 = vmatpush3.bf16.msra.mxu0 %v749_v3 }
  0x5b   :  { %379 = vmatpush2.bf16.msra.mxu1 %v717_v24  ;;  %667 = vmatprep.subr.bf16.mxu0 %v750_v4 }
  0x5c   :  { %380 = vmatprep.subr.bf16.mxu1 %v718_v25 }
  0x5e   :  { %668 = vmatpush3.bf16.msra.mxu0 %v751_v5 }
  0x5f   :  { %381 = vmatpush2.bf16.msra.mxu1 %v720_v26 }
  0x60   :  { %382 = vmatprep.subr.bf16.mxu1 %v721_v27 }
  0x63   :  { %383 = vmatpush2.bf16.msra.mxu1 %v723_v28 }
  0x64   :  { %384 = vmatprep.subr.bf16.mxu1 %v724_v29 }
  0x67   :  { %385 = vmatpush2.bf16.msra.mxu1 %v726_v30 }
  0x68   :  { %386 = vmatprep.subr.bf16.mxu1 %v727_v31 }
  0x6b   :  { %387 = vmatpush2.bf16.msra.mxu1 %v729_v32 }
  0x6c   :  { %388 = vmatprep.subr.bf16.mxu1 %v730_v33 }
  0x6f   :  { %389 = vmatpush2.bf16.msra.mxu1 %v732_v34 }
  0x70   :  { %390 = vmatprep.subr.bf16.mxu1 %v733_v35 }
  0x73   :  { %391 = vmatpush2.bf16.msra.mxu1 %v735_v36 }
  0xf9   :  { %v145_v56 = vpop.f32.mrf.mxu0 }
  0xfa   :  { %v146_v57 = vadd.f32 %v145_v56, %v90_v54 }
  0xfb   :  { %v147_v58 = vpop.f32.mrf.mxu0 }
  0xfc   :  { %v148_v59 = vadd.f32 %v147_v58, %v94_v55  ;;  %v152_v60 = vmax.f32 %v146_v57, 0.0 }
  0xfd   :  { %v149_v61 = vpop.f32.mrf.mxu0 }
  0xfe   :  { %v153_v62 = vmax.f32 %v148_v59, 0.0  ;;  %v154_v1 = vpack.c.bf16 %v152_v60, %v152_v60 }
  0xff   :  { %v150_v63 = vpop.f32.mrf.mxu0 }
 0x100   :  { %v155_v0 = vpack.c.bf16 %v153_v62, %v153_v62 }
 0x102   :  { %392 = vmatprep.mubr.bf16.mxu1 %v155_v0 }
 0x103   :  { %393 = vmatmul.mubr.bf16.vlgmr.msra.gmra.mxu1 %v154_v1 }
 0x1c3   :  { %v394_v9 = vpop.f32.mrf.mxu1 }
 0x1c4   :  { %v395_v10 = vadd.f32 %v394_v9, %v193_v7 }
 0x1c5   :  { %v396_v11 = vpop.f32.mrf.mxu1 }
 0x1c6   :  { %v397_v12 = vadd.f32 %v396_v11, %v197_v8  ;;  %v401_v13 = vmax.f32 %v395_v10, 0.0 }
 0x1c7   :  { %v398_v14 = vpop.f32.mrf.mxu1 }
 0x1c8   :  { %v402_v15 = vmax.f32 %v397_v12, 0.0  ;;  %v403_v18 = vpack.c.bf16 %v401_v13, %v401_v13 }
 0x1c9   :  { %v399_v16 = vpop.f32.mrf.mxu1 }
 0x1ca   :  { %v404_v17 = vpack.c.bf16 %v402_v15, %v402_v15 }
 0x1cc   :  { %572 = vmatprep.mubr.bf16.mxu0 %v404_v17 }
 0x1cd   :  { %573 = vmatmul.mubr.bf16.vlgmr.msra.gmra.mxu0 %v403_v18 }
 0x28d   :  { %v669_v19 = vpop.f32.mrf.mxu0 }
 0x28f   :  { %v670_v21 = vpop.f32.mrf.mxu0 }
 0x290   :  { %v671_v22 = vadd.f32 %v670_v21, %v669_v19 }
 0x291   :  { %v672_v23 = vpop.f32.mrf.mxu0 }
 0x292   :  { %v575_v24 = vadd.f32 %v671_v22, %v636_v20 }
 0x293   :  { %v673_v25 = vpop.f32.mrf.mxu0 }
 0x294   :  { %752 = vtanh.f32 %v575_v24 }
 0x2a1   :  { %v753_v26 = vpop.eup %752 }
 0x2a2   :  { %v581_v27 = vmul.f32 2.0, %v753_v26 }
 0x2a4   :  { %v582_v28 = vpack.c.bf16 %v581_v27, %v581_v27 }
 0x2a6   :  { %583 = vst [vmem:[#allocation10] sm:$0x1] %v582_v28 }
 0x2a7   :  { %845 = shalt.err (!%p842_p10)
}
 0x2a8   :  { %593 = dma.vmem_to_hbm [thread:$0]  %s591_s26, 16, %s943_s7, [#allocation4]  }
 0x2a9   :  { %860 = dma.done.wait [#allocation4], 16  }
 0x2aa   :  { %861 = vsyncadd [#allocation4], 4294967280 }
 0x2ab   :  { %597 = vsyncpa [#allocation3], 1 }
 0x2ac   :  { %598 = vsyncpa [#allocation6], 1 }
 0x2ad   :  { %599 = vsyncpa [#allocation9], 1 }
 0x2ae   :  { %600 = vsyncpa [#allocation4], 1 }

</bundles_post_ra>
